<compile_context>
chip_gen: v6e
topology: v6e:2x2x1
jax: 0.10.0
libtpu: 0.0.40
codegen_flags: <defaults>
</compile_context>

<pallas_src>
import functools

import jax
import jax.numpy as jnp
from jax.experimental import pallas as pl
from jax.experimental.pallas import tpu as pltpu


def _round_up(x, m):
    return ((x + m - 1) // m) * m


def _pick_tile_rows(n, c, itemsize, block_budget_bytes=4 << 20):
    """Rows per logits block: ~block_budget bytes, multiple of 8, <= 2048."""
    rows = block_budget_bytes // max(1, c * itemsize)
    rows = max(8, min(int(rows), 2048))
    # Do not exceed the batch (largest multiple of 8 <= N, floor of 8); the
    # ragged tail of the last block is masked in-kernel.
    rows = min(rows, max(8, (n // 8) * 8))
    return _round_up(rows, 8)


# ----------------------------------------------------------------------------
# Pallas kernel: one pass over the (N, C) logits, partial numerator per tile.
# ----------------------------------------------------------------------------
def _cb_loss_kernel(logits_ref, tgt_ref, sw_ref, out_ref, *, n_rows):
    step = pl.program_id(0)

    x = logits_ref[...].astype(jnp.float32)      # (tn, C), cast AFTER the DMA
    tgt = tgt_ref[...]                           # (tn, 1) int32
    sw = sw_ref[...]                             # (tn, 1) f32 per-sample weight
    tn, c = x.shape

    class_ids = jax.lax.broadcasted_iota(jnp.int32, (tn, c), 1)
    row_ids = step * tn + jax.lax.broadcasted_iota(jnp.int32, (tn, 1), 0)
    row_valid = row_ids < n_rows                 # mask ragged / OOB tail rows

    # numerically-stable per-row cross entropy without materializing log-softmax
    m = jnp.max(x, axis=-1, keepdims=True)                                 # (tn,1)
    lse = m + jnp.log(jnp.sum(jnp.exp(x - m), axis=-1, keepdims=True))     # (tn,1)
    z_t = jnp.sum(jnp.where(class_ids == tgt, x, 0.0), axis=-1,
                  keepdims=True)                                           # (tn,1)
    nll = lse - z_t                                                        # (tn,1)

    # where(...) (not mask-multiply) so garbage/NaN in OOB tail rows never leaks
    contrib = jnp.where(row_valid, sw * nll, 0.0)
    out_ref[...] = jnp.sum(contrib, axis=0, keepdims=True).reshape(1, 1, 1)


# ----------------------------------------------------------------------------
# wrapper
# ----------------------------------------------------------------------------
def class_balanced_loss(inputs, targets, *, num_classes, beta=0.999,
                        gamma=2.0):
    """inputs: (N, C) logits (any float dtype), targets: (N,) int -> scalar."""
    del gamma  # TODO(synk): gamma is stored by the PyTorch module but never
    #            used in its forward (no focal term), so it is unused here too.
    N, C = inputs.shape
    assert C == num_classes, (C, num_classes)

    targets = targets.astype(jnp.int32)

    # --- tiny per-class / per-sample weights in plain JAX (O(N + C) work) ---
    counts = jnp.zeros((num_classes,), jnp.float32).at[targets].add(1.0)
    eff = 1.0 - jnp.power(jnp.float32(beta), counts)
    w = (1.0 - jnp.float32(beta)) / eff
    w = w / jnp.sum(w) * jnp.float32(num_classes)
    sw = w[targets].astype(jnp.float32).reshape(N, 1)        # (N, 1)
    tgt2 = targets.reshape(N, 1)                             # (N, 1)

    # --- tiling from a VMEM budget (native dtype, no padding copies) ---
    itemsize = inputs.dtype.itemsize
    tn = _pick_tile_rows(N, C, itemsize)
    grid = pl.cdiv(N, tn)

    block_bytes = tn * (C * itemsize + 4 + 4)
    vmem_limit = int(max(8 << 20, min(48 << 20, 4 * block_bytes + (2 << 20))))

    partial = pl.pallas_call(
        functools.partial(_cb_loss_kernel, n_rows=N),
        out_shape=jax.ShapeDtypeStruct((grid, 1, 1), jnp.float32),
        grid=(grid,),
        in_specs=[pl.BlockSpec((tn, C), lambda i: (i, 0)),   # logits, native dtype
                  pl.BlockSpec((tn, 1), lambda i: (i, 0)),   # targets
                  pl.BlockSpec((tn, 1), lambda i: (i, 0))],  # per-sample weights
        out_specs=pl.BlockSpec((1, 1, 1), lambda i: (i, 0, 0)),
        compiler_params=pltpu.CompilerParams(
            dimension_semantics=("parallel",),
            vmem_limit_bytes=vmem_limit),
    )(inputs, tgt2, sw)

    num = jnp.sum(partial)          # sum of per-tile weighted-NLL partials
    den = jnp.sum(sw)               # sum of per-sample weights (tiny, in JAX)
    return num / den


# ----------------------------------------------------------------------------
# pure-JAX reference (mirrors the PyTorch module exactly)
# ----------------------------------------------------------------------------
def class_balanced_loss_ref(inputs, targets, num_classes, beta):
    counts = jnp.zeros((num_classes,), jnp.float32).at[targets].add(1.0)
    eff = 1.0 - jnp.power(jnp.float32(beta), counts)
    w = (1.0 - beta) / eff
    w = w / jnp.sum(w) * num_classes
    logp = jax.nn.log_softmax(inputs.astype(jnp.float32), axis=-1)
    nll = -jnp.take_along_axis(logp, targets[:, None], axis=-1)[:, 0]
    sw = w[targets]
    return jnp.sum(sw * nll) / jnp.sum(sw)


# ----------------------------------------------------------------------------
# main
# ----------------------------------------------------------------------------
if __name__ == "__main__":
    key = jax.random.PRNGKey(0)
    k1, k2, k3, k4 = jax.random.split(key, 4)

    # --- small case: batch=8, classes=4 (every class present) ---
    N, C = 8, 4
    x = jax.random.normal(k1, (N, C), jnp.float32)
    t = jax.random.permutation(k2, jnp.arange(N, dtype=jnp.int32) % C)
    loss = class_balanced_loss(x, t, num_classes=C, beta=0.999, gamma=2.0)
    loss = jax.block_until_ready(loss)
    ref = class_balanced_loss_ref(x, t, C, 0.999)
    assert loss.shape == (), loss.shape
    assert bool(jnp.isfinite(loss)), loss
    assert bool(jnp.allclose(loss, ref, rtol=1e-4, atol=1e-5)), (loss, ref)

    # --- ragged case: batch=300 (not a multiple of the row tile), classes=7 ---
    N2, C2 = 300, 7
    x2 = jax.random.normal(k3, (N2, C2), jnp.float32) * 3.0
    t2 = jax.random.permutation(k4, jnp.arange(N2, dtype=jnp.int32) % C2)
    loss2 = class_balanced_loss(x2, t2, num_classes=C2, beta=0.999, gamma=2.0)
    loss2 = jax.block_until_ready(loss2)
    ref2 = class_balanced_loss_ref(x2, t2, C2, 0.999)
    assert bool(jnp.isfinite(loss2)), loss2
    assert bool(jnp.allclose(loss2, ref2, rtol=1e-4, atol=1e-5)), (loss2, ref2)

    print("KERNEL_OK")
</pallas_src>

<mosaic_0001>
module attributes {stable_mosaic.version = 11 : i64} {
  func.func @_cb_loss_kernel(%arg0: i32, %arg1: memref<8x4xf32, #tpu.memory_space<vmem>>, %arg2: memref<8x1xi32, #tpu.memory_space<vmem>>, %arg3: memref<8x1xf32, #tpu.memory_space<vmem>>, %arg4: memref<1x1x1xf32, #tpu.memory_space<vmem>>) attributes {dimension_semantics = [#tpu.dimension_semantics<parallel>], iteration_bounds = array<i64: 1>, scalar_prefetch = 0 : i64, scratch_operands = 0 : i64, tpu.core_type = #tpu.core_type<tc>, window_params = [{transform_indices = @transform_0, window_bounds = array<i64: 8, 4>}, {transform_indices = @transform_1, window_bounds = array<i64: 8, 1>}, {transform_indices = @transform_2, window_bounds = array<i64: 8, 1>}, {transform_indices = @transform_3, window_bounds = array<i64: 1, 1, 1>}]} {
    %c0 = arith.constant 0 : index
    %c0_0 = arith.constant 0 : index
    %0 = vector.load %arg1[%c0, %c0_0] : memref<8x4xf32, #tpu.memory_space<vmem>>, vector<8x4xf32>
    %c0_1 = arith.constant 0 : index
    %c0_2 = arith.constant 0 : index
    %1 = vector.load %arg2[%c0_1, %c0_2] : memref<8x1xi32, #tpu.memory_space<vmem>>, vector<8x1xi32>
    %c0_3 = arith.constant 0 : index
    %c0_4 = arith.constant 0 : index
    %2 = vector.load %arg3[%c0_3, %c0_4] : memref<8x1xf32, #tpu.memory_space<vmem>>, vector<8x1xf32>
    %3 = tpu.iota {dimensions = array<i32: 1>} : vector<8x4xi32>
    %c8_i32 = arith.constant 8 : i32
    %4 = arith.muli %arg0, %c8_i32 : i32
    %5 = tpu.iota {dimensions = array<i32: 0>} : vector<8x1xi32>
    %6 = vector.broadcast %4 : i32 to vector<8x1xi32>
    %7 = arith.addi %6, %5 : vector<8x1xi32>
    %c8_i32_5 = arith.constant 8 : i32
    %8 = vector.broadcast %c8_i32_5 : i32 to vector<8x1xi32>
    %9 = arith.cmpi slt, %7, %8 : vector<8x1xi32>
    %cst = arith.constant dense<0xFF800000> : vector<8xf32>
    %10 = vector.multi_reduction <maximumf>, %0, %cst [1] : vector<8x4xf32> to vector<8xf32>
    %11 = vector.shape_cast %10 : vector<8xf32> to vector<8x1xf32>
    %12 = vector.broadcast %11 : vector<8x1xf32> to vector<8x4xf32>
    %13 = arith.subf %0, %12 : vector<8x4xf32>
    %14 = math.exp %13 : vector<8x4xf32>
    %cst_6 = arith.constant dense<0.000000e+00> : vector<8xf32>
    %15 = vector.multi_reduction <add>, %14, %cst_6 [1] : vector<8x4xf32> to vector<8xf32>
    %16 = vector.shape_cast %15 : vector<8xf32> to vector<8x1xf32>
    %17 = math.log %16 : vector<8x1xf32>
    %18 = arith.addf %11, %17 : vector<8x1xf32>
    %19 = vector.broadcast %1 : vector<8x1xi32> to vector<8x4xi32>
    %20 = arith.cmpi eq, %3, %19 : vector<8x4xi32>
    %cst_7 = arith.constant 0.000000e+00 : f32
    %21 = vector.broadcast %cst_7 : f32 to vector<8x4xf32>
    %22 = arith.select %20, %0, %21 : vector<8x4xi1>, vector<8x4xf32>
    %cst_8 = arith.constant dense<0.000000e+00> : vector<8xf32>
    %23 = vector.multi_reduction <add>, %22, %cst_8 [1] : vector<8x4xf32> to vector<8xf32>
    %24 = vector.shape_cast %23 : vector<8xf32> to vector<8x1xf32>
    %25 = arith.subf %18, %24 : vector<8x1xf32>
    %26 = arith.mulf %2, %25 : vector<8x1xf32>
    %cst_9 = arith.constant 0.000000e+00 : f32
    %27 = vector.broadcast %cst_9 : f32 to vector<8x1xf32>
    %28 = arith.select %9, %26, %27 : vector<8x1xi1>, vector<8x1xf32>
    %cst_10 = arith.constant dense<0.000000e+00> : vector<1xf32>
    %29 = vector.multi_reduction <add>, %28, %cst_10 [0] : vector<8x1xf32> to vector<1xf32>
    %30 = vector.shape_cast %29 : vector<1xf32> to vector<1x1xf32>
    %31 = vector.shape_cast %30 : vector<1x1xf32> to vector<1x1x1xf32>
    %c0_11 = arith.constant 0 : index
    %c0_12 = arith.constant 0 : index
    %c0_13 = arith.constant 0 : index
    %32 = vector.load %arg4[%c0_11, %c0_12, %c0_13] : memref<1x1x1xf32, #tpu.memory_space<vmem>>, vector<1x1x1xf32>
    tpu.vector_store %arg4[%c0_11, %c0_12, %c0_13], %31 {strides = array<i32>} : memref<1x1x1xf32, #tpu.memory_space<vmem>>, vector<1x1x1xf32>,
    return
  }
  func.func @transform_0(%arg0: i32) -> (i32, i32) {
    %c0_i32 = arith.constant 0 : i32
    %c0_i32_0 = arith.constant 0 : i32
    return %arg0, %c0_i32 : i32, i32
  }
  func.func @transform_1(%arg0: i32) -> (i32, i32) {
    %c0_i32 = arith.constant 0 : i32
    %c0_i32_0 = arith.constant 0 : i32
    return %arg0, %c0_i32 : i32, i32
  }
  func.func @transform_2(%arg0: i32) -> (i32, i32) {
    %c0_i32 = arith.constant 0 : i32
    %c0_i32_0 = arith.constant 0 : i32
    return %arg0, %c0_i32 : i32, i32
  }
  func.func @transform_3(%arg0: i32) -> (i32, i32, i32) {
    %c0_i32 = arith.constant 0 : i32
    %c0_i32_0 = arith.constant 0 : i32
    %c0_i32_1 = arith.constant 0 : i32
    return %arg0, %c0_i32, %c0_i32_0 : i32, i32, i32
  }
}

</mosaic_0001>

<bundles_post_ra>
// kernel: tpu_custom_call.1
= control target key start
LH: loop header
LB: loop body
LE: loop exit
PB: predicated region body
PF: predicated region fallthrough
CT: control target
= control target key end

     0   :  { %vm26_vm0 = vcmask 31744   ;;  %s140_s0 = inlined_call_operand.vmem [shape: f32[8,4], index: 0, kind: input, shape index: {}]   ;;  %s141_s1 = inlined_call_operand.vmem [shape: s32[8,1], index: 1, kind: input, shape index: {}]   ;;  %s142_s2 = inlined_call_operand.vmem [shape: f32[8,1], index: 2, kind: input, shape index: {}]   ;;  %s143_s3 = inlined_call_operand.hbm [shape: f32[1,1,1], index: 3, kind: output, shape index: {}]  }
   0x1   :  { %v15_v0 = vld [vmem:[%s140_s0] sm:$0xff] }
   0x2   :  { %8 = vsyncpa [#allocation3], 0  ;;  %v27_v1 = vsel %vm26_vm0, %v15_v0, -inf  ;;  %v103_v2 = vmov 0   ;;  %v16_v3 = vld [vmem:[%s141_s1] sm:$0xff]  ;;  %v18_v7 = vlaneseq  ;;  %vm50_vm2 = vcmask 7168  }
   0x3   :  { %76 = vset.pattern.permute.xlu0 %v103_v2  ;;  %v17_v19 = vld [vmem:[%s142_s2] sm:$0xff]  ;;  %s104_s16 = smov [#allocation2]   ;;  %vm58_vm3 = vcmask 0  }
   0x4   :  { %28 = vmax.xlane.f32.xlu0 %v27_v1  ;;  %v19_v8 = vand.u32 127, %v18_v7  ;;  %s66_s17 = sshll.u32 %s104_s16, 4  ;;  %s67_s17 = int_to_ptr.vmem [resolvable:$true] %s66_s17 }
   0x5   :  { %s81_s18 = scalar_lea.vmem %s67_s17, 16  ;;  %s85_s19 = scalar_lea.vmem %s67_s17, 32 }
   0x6   :  { %p82_p0 = scmp.ne.s32.totalorder %s67_s17, %s81_s18  ;;  %p86_p1 = scmp.lt.s32.totalorder %s67_s17, %s67_s17 }
   0x7   :  { %p87_p2 = scmp.lt.s32.totalorder %s85_s19, %s81_s18 }
   0x9   :  { %p88_p3 = por %p87_p2, %p86_p1 }
   0xb   :  { %p89_p4 = pnand %p88_p3, %p82_p0 }
  0x1a   :  { %40 = vperm.xlu0 %76, %v16_v3  }
  0x8d   :  { %v29_v4 = vpop.xlane.xlu0 %28 }
  0x8e   :  { %v30_v5 = vsub.f32 %v15_v0, %v29_v4 }
  0x90   :  { %v31_v6 = vmul.f32 1.442695, %v30_v5 }
  0x92   :  { %77 = vpow2.f32 %v31_v6 }
  0x95   :  { %v41_v9 = vpop.permute.xlu0 %40 }
  0x96   :  { %vm42_vm1 = vcmp.eq.s32.totalorder %v19_v8, %v41_v9 }
  0x97   :  { %v43_v11 = vsel %vm42_vm1, %v15_v0, 0.0 }
  0x98   :  { %v44_v13 = vsel %vm26_vm0, %v43_v11, 0.0 }
  0x9f   :  { %v78_v10 = vpop.eup %77 }
  0xa0   :  { %v33_v12 = vsel %vm26_vm0, %v78_v10, 0.0 }
  0xa1   :  { %34 = vadd.xlane.f32.xlu1 %v33_v12 }
  0xa5   :  { %45 = vadd.xlane.f32.xlu1 %v44_v13 }
 0x12a   :  { %v35_v14 = vpop.xlane.xlu1 %34 }
 0x12b   :  { %79 = vlog2.f32 %v35_v14 }
 0x12e   :  { %v46_v17 = vpop.xlane.xlu1 %45 }
 0x138   :  { %v80_v15 = vpop.eup %79 }
 0x139   :  { %v37_v16 = vmul.f32 0.6931472, %v80_v15 }
 0x13b   :  { %v38_v18 = vadd.f32 %v37_v16, %v29_v4 }
 0x13d   :  { %v47_v20 = vsub.f32 %v38_v18, %v46_v17 }
 0x13f   :  { %v48_v21 = vmul.f32 %v47_v20, %v17_v19 }
 0x141   :  { %v51_v22 = vsel %vm50_vm2, %v48_v21, 0.0 }
 0x142   :  { %v52_v23 = vrot.slane %v51_v22, 4 }
 0x144   :  { %v53_v24 = vadd.f32 %v52_v23, %v51_v22 }
 0x146   :  { %v54_v25 = vrot.slane %v53_v24, 2 }
 0x148   :  { %v55_v26 = vadd.f32 %v54_v25, %v53_v24 }
 0x14a   :  { %v56_v27 = vrot.slane %v55_v26, 1 }
 0x14c   :  { %v57_v28 = vadd.f32 %v56_v27, %v55_v26 }
 0x14e   :  { %59 = vst.msk [vmem:[#allocation2] sm:$0x1] %vm58_vm3, %v57_v28 }
 0x14f   :  { %92 = shalt.err (!%p89_p4)
}
 0x150   :  { %69 = dma.vmem_to_hbm [thread:$0]  %s67_s17, 16, %s143_s3, [#allocation3]  }
 0x151   :  { %101 = dma.done.wait [#allocation3], 16  }
 0x152   :  { %102 = vsyncadd [#allocation3], 4294967280 }
 0x153   :  { %73 = vsyncpa [#allocation3], 1 }

</bundles_post_ra>
